<compile_context>
chip_gen: v5e
topology: v5e:2x2
jax: 0.10.0
libtpu: 0.0.40
codegen_flags: <defaults>
</compile_context>

<pallas_src>
from functools import partial

import jax
import jax.numpy as jnp
from jax import lax
from jax.experimental import pallas as pl
from jax.experimental.pallas import tpu as pltpu


def head_kernel(x_ref, w_ref, o_ref, *, T, H):
    # x_ref: (bb*T, C)    flattened batch-block of tokens
    # w_ref: (C, 3H)      fused [Wk | Wq*H^-0.5 | Wv]
    # o_ref: (bb, T*H)    lane-dense output block
    bb = o_ref.shape[0]

    x = x_ref[...].astype(jnp.float32)          # (bb*T, C)
    w = w_ref[...].astype(jnp.float32)          # (C, 3H)

    # Single fused projection matmul (MXU): (bb*T, C) @ (C, 3H) -> (bb*T, 3H)
    qkv = jnp.dot(x, w, preferred_element_type=jnp.float32)
    qkv = qkv.reshape(bb, T, 3 * H)
    k = qkv[:, :, 0:H]                          # (bb, T, H)
    q = qkv[:, :, H:2 * H]                      # (bb, T, H)  (already scaled)
    v = qkv[:, :, 2 * H:3 * H]                  # (bb, T, H)

    # Batched Q @ K^T: contract the H dim of both operands, batch over bb.
    # No explicit transpose / XLU shuffle.
    s = lax.dot_general(
        q, k,
        dimension_numbers=(((2,), (2,)), ((0,), (0,))),
        preferred_element_type=jnp.float32,
    )                                           # (bb, T, T)

    # Causal mask: keep col <= row, else -inf (diagonal always unmasked, so no
    # all--inf softmax row).
    row = lax.broadcasted_iota(jnp.int32, (T, T), 0)
    col = lax.broadcasted_iota(jnp.int32, (T, T), 1)
    s = jnp.where((col <= row)[None, :, :], s, -jnp.inf)

    # Softmax along last axis; reciprocal routed to the EUP slot.
    s = s - jnp.max(s, axis=-1, keepdims=True)
    p = jnp.exp(s)
    p = p * pl.reciprocal(jnp.sum(p, axis=-1, keepdims=True), approx=True)

    # Dropout (eval mode / p=0): identity.

    # Batched attention-weighted values: (bb, T, T) @ (bb, T, H) -> (bb, T, H)
    out = lax.dot_general(
        p, v,
        dimension_numbers=(((2,), (1,)), ((0,), (0,))),
        preferred_element_type=jnp.float32,
    )

    # Lane-dense store: (bb, T*H) with T*H = 128 -> unmasked full-lane vst.
    o_ref[...] = out.reshape(bb, T * H).astype(o_ref.dtype)


def prepare_head_weights(wk, wq, wv):
    """One-time weight prep: fuse [Wk | Wq*scale | Wv] into a (C, 3H) matrix.

    Weights are in (in, out) = (C, H) layout (transposed nn.Linear weights).
    The 1/sqrt(H) attention scale is folded into the query weights here.
    """
    H = wk.shape[1]
    scale = H ** -0.5
    return jnp.concatenate([wk, wq * scale, wv], axis=1)   # (C, 3H)


def _choose_batch_block(B, T):
    """Pick batch elements per grid step: aim for ~256 matmul rows per step,
    while keeping the block a divisor of B and sublane-friendly."""
    target = max(1, 256 // max(T, 1))
    for bb in range(min(target, B), 0, -1):
        if B % bb == 0 and (bb == B or bb % 8 == 0):
            return bb
    return B


def head_forward(x, w_qkv):
    """x: (B, T, C) float32; w_qkv: (C, 3H) fused/prescaled.  Returns (B, T, H)."""
    B, T, C = x.shape
    H = w_qkv.shape[1] // 3
    bb = _choose_batch_block(B, T)
    grid = (B // bb,)

    # Present x as (B*T, C) so each grid step runs one tall projection matmul.
    x2 = x.reshape(B * T, C)

    out2 = pl.pallas_call(
        partial(head_kernel, T=T, H=H),
        out_shape=jax.ShapeDtypeStruct((B, T * H), x.dtype),
        grid_spec=pltpu.PrefetchScalarGridSpec(
            num_scalar_prefetch=0,
            grid=grid,
            in_specs=[
                pl.BlockSpec((bb * T, C), lambda i: (i, 0)),
                pl.BlockSpec((C, 3 * H), lambda i: (0, 0)),
            ],
            out_specs=pl.BlockSpec((bb, T * H), lambda i: (i, 0)),
        ),
        compiler_params=pltpu.CompilerParams(
            dimension_semantics=("parallel",),
        ),
    )(x2, w_qkv)

    return out2.reshape(B, T, H)


def head_reference(x, wk, wq, wv):
    """Pure-JAX reference matching the PyTorch forward."""
    k = x @ wk
    q = x @ wq
    v = x @ wv
    T = x.shape[1]
    scale = k.shape[-1] ** -0.5
    wei = jnp.einsum("btd,bsd->bts", q, k) * scale
    mask = jnp.tril(jnp.ones((T, T), dtype=bool))
    wei = jnp.where(mask, wei, -jnp.inf)
    wei = jax.nn.softmax(wei, axis=-1)
    return jnp.einsum("bts,bsd->btd", wei, v)


if __name__ == "__main__":
    B, T, C, H = 2, 8, 32, 16   # batch, block_size, n_embed, head_size

    key = jax.random.PRNGKey(0)
    kx, kk, kq, kv = jax.random.split(key, 4)

    x = jax.random.normal(kx, (B, T, C), dtype=jnp.float32)
    # Deterministic "weights" (transposed nn.Linear weights, i.e. (in, out)).
    wk = jax.random.normal(kk, (C, H), dtype=jnp.float32) * 0.1
    wq = jax.random.normal(kq, (C, H), dtype=jnp.float32) * 0.1
    wv = jax.random.normal(kv, (C, H), dtype=jnp.float32) * 0.1

    # One-time weight prep (fused QKV, query pre-scaled by H**-0.5).
    w_qkv = prepare_head_weights(wk, wq, wv)

    out = head_forward(x, w_qkv)
    out = jax.block_until_ready(out)

    ref = head_reference(x, wk, wq, wv)
    assert out.shape == (B, T, H)
    # Slightly loose tolerance: approx (EUP) reciprocal in the softmax denom.
    assert jnp.allclose(out, ref, atol=5e-3, rtol=5e-3), "mismatch vs reference"

    print("KERNEL_OK")
</pallas_src>

<mosaic_0001>
module attributes {stable_mosaic.version = 11 : i64} {
  func.func @head_kernel(%arg0: i32, %arg1: memref<16x32xf32, #tpu.memory_space<vmem>>, %arg2: memref<32x48xf32, #tpu.memory_space<vmem>>, %arg3: memref<2x128xf32, #tpu.memory_space<vmem>>) attributes {dimension_semantics = [#tpu.dimension_semantics<parallel>], iteration_bounds = array<i64: 1>, scalar_prefetch = 0 : i64, scratch_operands = 0 : i64, tpu.core_type = #tpu.core_type<tc>, window_params = [{transform_indices = @transform_0, window_bounds = array<i64: 16, 32>}, {pipeline_mode = #tpu.pipeline_mode<synchronous>, transform_indices = @transform_1, window_bounds = array<i64: 32, 48>}, {transform_indices = @transform_2, window_bounds = array<i64: 2, 128>}]} {
    %c0 = arith.constant 0 : index
    %c0_0 = arith.constant 0 : index
    %0 = vector.load %arg1[%c0, %c0_0] : memref<16x32xf32, #tpu.memory_space<vmem>>, vector<16x32xf32>
    %c0_1 = arith.constant 0 : index
    %c0_2 = arith.constant 0 : index
    %1 = vector.load %arg2[%c0_1, %c0_2] : memref<32x48xf32, #tpu.memory_space<vmem>>, vector<32x48xf32>
    %cst = arith.constant dense<0.000000e+00> : vector<16x48xf32>
    %2 = tpu.matmul %0, %1, %cst {dimension_numbers = #tpu.dot_dimension_numbers<[1], [0], [0], [1], [0, 0, 1, 1], [], []>} : vector<16x32xf32>, vector<32x48xf32>, vector<16x48xf32> -> vector<16x48xf32>
    %3 = vector.shape_cast %2 : vector<16x48xf32> to vector<2x8x48xf32>
    %4 = vector.extract_strided_slice %3 {offsets = [0, 0, 0], sizes = [2, 8, 16], strides = [1, 1, 1]} : vector<2x8x48xf32> to vector<2x8x16xf32>
    %5 = vector.extract_strided_slice %3 {offsets = [0, 0, 16], sizes = [2, 8, 16], strides = [1, 1, 1]} : vector<2x8x48xf32> to vector<2x8x16xf32>
    %6 = vector.extract_strided_slice %3 {offsets = [0, 0, 32], sizes = [2, 8, 16], strides = [1, 1, 1]} : vector<2x8x48xf32> to vector<2x8x16xf32>
    %cst_3 = arith.constant dense<0.000000e+00> : vector<2x8x8xf32>
    %7 = tpu.matmul %5, %4, %cst_3 {dimension_numbers = #tpu.dot_dimension_numbers<[2], [2], [1], [1], [0, 0, 0, 1, 1, 1], [0], [0]>} : vector<2x8x16xf32>, vector<2x8x16xf32>, vector<2x8x8xf32> -> vector<2x8x8xf32>
    %8 = tpu.iota {dimensions = array<i32: 0>} : vector<8x8xi32>
    %9 = tpu.iota {dimensions = array<i32: 1>} : vector<8x8xi32>
    %10 = arith.cmpi sle, %9, %8 : vector<8x8xi32>
    %11 = vector.shape_cast %10 : vector<8x8xi1> to vector<1x8x8xi1>
    %cst_4 = arith.constant 0xFF800000 : f32
    %12 = vector.shape_cast %11 : vector<1x8x8xi1> to vector<1x8x8xi1>
    %13 = vector.broadcast %12 : vector<1x8x8xi1> to vector<2x8x8xi1>
    %14 = vector.broadcast %cst_4 : f32 to vector<2x8x8xf32>
    %15 = arith.select %13, %7, %14 : vector<2x8x8xi1>, vector<2x8x8xf32>
    %cst_5 = arith.constant dense<0xFF800000> : vector<2x8xf32>
    %16 = vector.multi_reduction <maximumf>, %15, %cst_5 [2] : vector<2x8x8xf32> to vector<2x8xf32>
    %17 = vector.shape_cast %16 : vector<2x8xf32> to vector<2x8x1xf32>
    %18 = vector.broadcast %17 : vector<2x8x1xf32> to vector<2x8x8xf32>
    %19 = arith.subf %15, %18 : vector<2x8x8xf32>
    %20 = math.exp %19 : vector<2x8x8xf32>
    %cst_6 = arith.constant dense<0.000000e+00> : vector<2x8xf32>
    %21 = vector.multi_reduction <add>, %20, %cst_6 [2] : vector<2x8x8xf32> to vector<2x8xf32>
    %22 = vector.shape_cast %21 : vector<2x8xf32> to vector<2x8x1xf32>
    %23 = tpu.reciprocal %22 {approx = true} : vector<2x8x1xf32> -> vector<2x8x1xf32>
    %24 = vector.broadcast %23 : vector<2x8x1xf32> to vector<2x8x8xf32>
    %25 = arith.mulf %20, %24 : vector<2x8x8xf32>
    %cst_7 = arith.constant dense<0.000000e+00> : vector<2x8x16xf32>
    %26 = tpu.matmul %25, %6, %cst_7 {dimension_numbers = #tpu.dot_dimension_numbers<[2], [1], [1], [2], [0, 0, 0, 1, 1, 2], [0], [0]>} : vector<2x8x8xf32>, vector<2x8x16xf32>, vector<2x8x16xf32> -> vector<2x8x16xf32>
    %27 = vector.shape_cast %26 : vector<2x8x16xf32> to vector<2x128xf32>
    %c0_8 = arith.constant 0 : index
    %c0_9 = arith.constant 0 : index
    %28 = vector.load %arg3[%c0_8, %c0_9] : memref<2x128xf32, #tpu.memory_space<vmem>>, vector<2x128xf32>
    tpu.vector_store %arg3[%c0_8, %c0_9], %27 {strides = array<i32>} : memref<2x128xf32, #tpu.memory_space<vmem>>, vector<2x128xf32>,
    return
  }
  func.func @transform_0(%arg0: i32) -> (i32, i32) {
    %c0_i32 = arith.constant 0 : i32
    %c0_i32_0 = arith.constant 0 : i32
    return %arg0, %c0_i32 : i32, i32
  }
  func.func @transform_1(%arg0: i32) -> (i32, i32) {
    %c0_i32 = arith.constant 0 : i32
    %c0_i32_0 = arith.constant 0 : i32
    %c0_i32_1 = arith.constant 0 : i32
    return %c0_i32, %c0_i32_0 : i32, i32
  }
  func.func @transform_2(%arg0: i32) -> (i32, i32) {
    %c0_i32 = arith.constant 0 : i32
    %c0_i32_0 = arith.constant 0 : i32
    return %arg0, %c0_i32 : i32, i32
  }
}

</mosaic_0001>

<bundles_post_ra>
// kernel: tpu_custom_call.1
= control target key start
LH: loop header
LB: loop body
LE: loop exit
PB: predicated region body
PF: predicated region fallthrough
CT: control target
= control target key end

     0   :  { %7 = vsyncpa [#allocation3], 0  ;;  %s507_s0 = inlined_call_operand.hbm [shape: f32[16,32], index: 0, kind: input, shape index: {}]   ;;  %s508_s1 = inlined_call_operand.hbm [shape: f32[32,48], index: 1, kind: input, shape index: {}]   ;;  %s509_s2 = inlined_call_operand.hbm [shape: f32[2,128], index: 2, kind: output, shape index: {}]  }
   0x1   :  { %8 = vsyncpa [#allocation6], 0 }
   0x2   :  { %9 = vsyncpa [#allocation4], 0  ;;  %s14_s11 = sshll.u32 %s507_s0, 4  ;;  %s439_s12 = smov [#allocation2]   ;;  %s15_s11 = int_to_ptr.hbm [resolvable:$true] %s14_s11 }
   0x3   :  { %s16_s13 = sshll.u32 %s439_s12, 4  ;;  %s27_s16 = sshll.u32 %s508_s1, 4  ;;  %s17_s13 = int_to_ptr.vmem [resolvable:$true] %s16_s13  ;;  %s28_s16 = int_to_ptr.hbm [resolvable:$true] %s27_s16 }
   0x4   :  { %s440_s17 = smov 128   ;;  %s441_s18 = smov 8  }
   0x5   :  { %22 = dma.hbm_to_vmem [thread:$0]  %s15_s11, 256, %s17_s13, [#allocation3], %s440_s17, %s440_s17, %s441_s18  }
   0x6   :  { %s442_s19 = smov [#allocation5]  }
   0x7   :  { %s29_s20 = sshll.u32 %s442_s19, 4  ;;  %s30_s20 = int_to_ptr.vmem [resolvable:$true] %s29_s20 }
   0x8   :  { %35 = dma.hbm_to_vmem [thread:$0]  %s28_s16, 512, %s30_s20, [#allocation6], %s440_s17, %s440_s17, %s441_s18  }
   0x9   :  { %433 = dma.done.wait [#allocation3], 256  }
   0xa   :  { %434 = vsyncadd [#allocation3], 4294967040 }
   0xb   :  { %435 = dma.done.wait [#allocation6], 512  }
   0xc   :  { %436 = vsyncadd [#allocation6], 4294966784  ;;  %v49_v0 = vld [vmem:[#allocation5 + $0x18] sm:$0xff]  ;;  %v48_v1 = vld [vmem:[#allocation5 + $0x10] sm:$0xff]  ;;  %vm50_vm0 = vcmask 261120   ;;  %vm83_vm1 = vcmask 130048   ;;  %v135_v11 = vlaneseq }
   0xd   :  { %69 = vmatpush.msra.mxu0 %v49_v0  ;;  %v47_v2 = vld [vmem:[#allocation5 + $0x8] sm:$0xff]  ;;  %v46_v3 = vld [vmem:[#allocation5] sm:$0xff]  ;;  %v44_v4 = vld [vmem:[#allocation2] sm:$0xff]  ;;  %s443_s0 = smov 112   ;;  %s444_s1 = smov 96   ;;  %vm144_vm3 = vcmask 64512  }
   0xe   :  { %v45_v5 = vld [vmem:[#allocation2 + $0x8] sm:$0xff]  ;;  %v136_v12 = vshrl.u32 %v135_v11, 7  ;;  %v138_v13 = vand.u32 127, %v135_v11  ;;  %v445_v37 = vmov 1983009808   ;;  %vm220_vm4 = vcmask 1047556  }
   0xf   :  { %70 = vmatpush.msra.mxu0 %v48_v1  ;;  %v223_v38 = vunpack.c.l.s4 %v445_v37  ;;  %v446_v42 = vmov 1934713408   ;;  %s447_s21 = smov 32   ;;  %s448_s22 = smov 16   ;;  %vm302_vm5 = vcmask 392192   ;;  %vm304_vm6 = vcmask 523264  }
  0x10   :  { %vm139_vm2 = vcmp.le.s32.totalorder %v138_v13, %v136_v12  ;;  %v245_v43 = vunpack.c.l.s4 %v446_v42  ;;  %s449_s23 = smov 48   ;;  %s450_s24 = smov 80   ;;  %vm306_vm7 = vcmask 654336   ;;  %vm308_vm8 = vcmask 785408  }
  0x11   :  { %71 = vmatpush.msra.mxu0 %v47_v2  ;;  %v224_v41 = vunpack.c.0.s8 %v223_v38  ;;  %s451_s25 = smov 64   ;;  %s452_s26 = smov [#allocation7]   ;;  %vm310_vm9 = vcmask 916480  }
  0x12   :  { %v246_v48 = vunpack.c.0.s8 %v245_v43  ;;  %s318_s27 = sshll.u32 %s452_s26, 4  ;;  %s320_s30 = sshll.u32 %s509_s2, 4  ;;  %s319_s27 = int_to_ptr.vmem [resolvable:$true] %s318_s27  ;;  %s321_s30 = int_to_ptr.hbm [resolvable:$true] %s320_s30 }
  0x13   :  { %72 = vmatpush.msra.mxu0 %v46_v3 }
  0x14   :  { %331 = vmatmul.msk.f32.vlgmr.msra.gmra.mxu0 %vm50_vm0, %v44_v4 }
  0x1c   :  { %332 = vmatmul.msk.f32.gmra.mxu0 %vm50_vm0, %v45_v5 }
  0x91   :  { %v74_v6 = vpop.f32.mrf.mxu0 }
  0x92   :  { %81 = vrot.lane.b32.xlu0 %v74_v6, %s443_s0  ;;  %333 = vmatpush.xpose.msk.msra.mxu1 %vm83_vm1, %v74_v6 }
  0x99   :  { %v77_v7 = vpop.f32.mrf.mxu0 }
  0x9a   :  { %109 = vrot.lane.b32.xlu0 %v77_v7, %s443_s0  ;;  %335 = vmatpush.xpose.msk.msra.mxu2 %vm83_vm1, %v77_v7 }
  0xa2   :  { %167 = vrot.lane.b32.xlu0 %v74_v6, %s444_s1 }
 0x104   :  { %v82_v8 = vpop.permute.xlu0 %81 }
 0x105   :  { %334 = vmatmul.msk.f32.vlgmr.msra.gmra.mxu1 %vm83_vm1, %v82_v8 }
 0x10c   :  { %v110_v9 = vpop.permute.xlu0 %109 }
 0x10d   :  { %336 = vmatmul.msk.f32.vlgmr.msra.gmra.mxu2 %vm83_vm1, %v110_v9 }
 0x114   :  { %v168_v10 = vpop.permute.xlu0 %167 }
 0x115   :  { %188 = vmatpush.msra.mxu3 %v168_v10 }
 0x182   :  { %v105_v14 = vpop.f32.mrf.mxu1 }
 0x183   :  { %v142_v15 = vsel %vm139_vm2, %v105_v14, -inf }
 0x184   :  { %v145_v16 = vsel %vm144_vm3, %v142_v15, -inf }
 0x185   :  { %146 = vmax.xlane.f32.xlu1 %v145_v16 }
 0x190   :  { %v132_v17 = vpop.f32.mrf.mxu2 }
 0x191   :  { %v143_v18 = vsel %vm139_vm2, %v132_v17, -inf }
 0x192   :  { %v148_v19 = vsel %vm144_vm3, %v143_v18, -inf }
 0x193   :  { %149 = vmax.xlane.f32.xlu1 %v148_v19 }
 0x1ac   :  { %193 = vrot.lane.b32.xlu1 %v77_v7, %s444_s1 }
 0x1f8   :  { %v147_v20 = vpop.xlane.xlu1 %146 }
 0x1f9   :  { %v151_v21 = vsub.f32 %v142_v15, %v147_v20 }
 0x1fb   :  { %v153_v22 = vmul.f32 1.442695, %v151_v21 }
 0x1fd   :  { %353 = vpow2.f32 %v153_v22 }
 0x203   :  { %v354_v23 = vpop.eup %353 }
 0x204   :  { %v157_v24 = vsel %vm144_vm3, %v354_v23, 0.0 }
 0x205   :  { %158 = vadd.xlane.f32.xlu2 %v157_v24 }
 0x206   :  { %v150_v25 = vpop.xlane.xlu1 %149 }
 0x207   :  { %v152_v26 = vsub.f32 %v143_v18, %v150_v25 }
 0x209   :  { %v155_v27 = vmul.f32 1.442695, %v152_v26 }
 0x20b   :  { %355 = vpow2.f32 %v155_v27 }
 0x211   :  { %v356_v28 = vpop.eup %355 }
 0x212   :  { %v160_v29 = vsel %vm144_vm3, %v356_v28, 0.0 }
 0x213   :  { %161 = vadd.xlane.f32.xlu2 %v160_v29 }
 0x21e   :  { %v194_v30 = vpop.permute.xlu1 %193 }
 0x21f   :  { %214 = vmatpush.msrb.mxu3 %v194_v30 }
 0x278   :  { %v159_v31 = vpop.xlane.xlu2 %158 }
 0x279   :  { %357 = vrcp.f32 %v159_v31 }
 0x27f   :  { %v358_v32 = vpop.eup %357 }
 0x280   :  { %v165_v33 = vmul.f32 %v358_v32, %v354_v23 }
 0x282   :  { %337 = vmatmul.msk.f32.vlgmr.msra.gmra.mxu3 %vm144_vm3, %v165_v33 }
 0x286   :  { %v162_v34 = vpop.xlane.xlu2 %161 }
 0x287   :  { %359 = vrcp.f32 %v162_v34 }
 0x28d   :  { %v360_v35 = vpop.eup %359 }
 0x28e   :  { %v166_v36 = vmul.f32 %v360_v35, %v356_v28 }
 0x290   :  { %338 = vmatmul.msk.f32.vlgmr.msrb.gmra.mxu3 %vm144_vm3, %v166_v36 }
 0x305   :  { %v190_v39 = vpop.f32.mrf.mxu3 }
 0x306   :  { %v219_v40 = vrot.slane %v190_v39, 4  ;;  %v225_v45 = vperm.slane %v190_v39, %v224_v41 }
 0x308   :  { %v221_v44 = vsel %vm220_vm4, 0.0, %v219_v40  ;;  %v242_v49 = vrot.slane %v225_v45, 4 }
 0x309   :  { %v229_v46 = vperm.slane %v221_v44, %v224_v41 }
 0x30b   :  { %v254_v55 = vrot.slane %v229_v46, 4 }
 0x313   :  { %v216_v47 = vpop.f32.mrf.mxu3 }
 0x314   :  { %v230_v50 = vrot.slane %v216_v47, 4  ;;  %v235_v51 = vperm.slane %v216_v47, %v224_v41 }
 0x316   :  { %v231_v52 = vsel %vm220_vm4, 0.0, %v230_v50  ;;  %v240_v53 = vrot.slane %v235_v51, 4  ;;  %v243_v54 = vsel %vm220_vm4, %v235_v51, %v242_v49 }
 0x317   :  { %v239_v56 = vperm.slane %v231_v52, %v224_v41  ;;  %v251_v57 = vperm.slane %v243_v54, %v246_v48 }
 0x318   :  { %v241_v58 = vsel %vm220_vm4, %v240_v53, %v225_v45 }
 0x319   :  { %v252_v59 = vrot.slane %v239_v56, 4  ;;  %277 = vrot.lane.b32.xlu0 %v251_v57, %s447_s21  ;;  %v255_v60 = vsel %vm220_vm4, %v239_v56, %v254_v55  ;;  %v247_v61 = vperm.slane %v241_v58, %v246_v48  ;;  %v266_v1 = vrot.slane %v251_v57, 4 }
 0x31a   :  { %v263_v62 = vperm.slane %v255_v60, %v246_v48 }
 0x31b   :  { %v264_v63 = vrot.slane %v247_v61, 4  ;;  %v253_v0 = vsel %vm220_vm4, %v252_v59, %v229_v46  ;;  %v267_v4 = vsel %vm220_vm4, 0.0, %v266_v1 }
 0x31c   :  { %293 = vrot.lane.b32.xlu1 %v263_v62, %s444_s1  ;;  %v259_v3 = vperm.slane %v253_v0, %v246_v48  ;;  %v270_v7 = vrot.slane %v263_v62, 4 }
 0x31d   :  { %v265_v2 = vsel %vm220_vm4, 0.0, %v264_v63 }
 0x31e   :  { %273 = vrot.lane.b32.xlu2 %v265_v2, %s448_s22  ;;  %v268_v5 = vrot.slane %v259_v3, 4  ;;  %v271_v8 = vsel %vm220_vm4, 0.0, %v270_v7 }
 0x320   :  { %v269_v6 = vsel %vm220_vm4, 0.0, %v268_v5 }
 0x321   :  { %281 = vrot.lane.b32.xlu0 %v267_v4, %s449_s23 }
 0x326   :  { %289 = vrot.lane.b32.xlu2 %v269_v6, %s450_s24 }
 0x329   :  { %285 = vrot.lane.b32.xlu0 %v259_v3, %s451_s25 }
 0x331   :  { %297 = vrot.lane.b32.xlu0 %v271_v8, %s443_s0 }
 0x378   :  { %v274_v11 = vpop.permute.xlu2 %273 }
 0x379   :  { %v300_v12 = vsel %vm83_vm1, %v247_v61, %v274_v11 }
 0x380   :  { %v290_v17 = vpop.permute.xlu2 %289 }
 0x38b   :  { %v278_v9 = vpop.permute.xlu0 %277 }
 0x38c   :  { %v301_v13 = vsel %vm50_vm0, %v300_v12, %v278_v9 }
 0x38e   :  { %v294_v19 = vpop.permute.xlu1 %293 }
 0x393   :  { %v282_v10 = vpop.permute.xlu0 %281 }
 0x394   :  { %v303_v15 = vsel %vm302_vm5, %v301_v13, %v282_v10 }
 0x39b   :  { %v286_v14 = vpop.permute.xlu0 %285 }
 0x39c   :  { %v305_v16 = vsel %vm304_vm6, %v303_v15, %v286_v14 }
 0x39d   :  { %v307_v18 = vsel %vm306_vm7, %v305_v16, %v290_v17 }
 0x39e   :  { %v309_v21 = vsel %vm308_vm8, %v307_v18, %v294_v19 }
 0x3a3   :  { %v298_v20 = vpop.permute.xlu0 %297 }
 0x3a4   :  { %v311_v22 = vsel %vm310_vm9, %v309_v21, %v298_v20 }
 0x3a5   :  { %312 = vst [vmem:[#allocation7] sm:$0x3] %v311_v22 }
 0x3a6   :  { %323 = dma.vmem_to_hbm [thread:$0]  %s319_s27, 32, %s321_s30, [#allocation4]  }
 0x3a7   :  { %437 = dma.done.wait [#allocation4], 32  }
 0x3a8   :  { %438 = vsyncadd [#allocation4], 4294967264 }
 0x3a9   :  { %328 = vsyncpa [#allocation3], 1 }
 0x3aa   :  { %329 = vsyncpa [#allocation6], 1 }
 0x3ab   :  { %330 = vsyncpa [#allocation4], 1 }

</bundles_post_ra>
